<compile_context>
chip_gen: v5e
topology: v5e:2x2
jax: 0.10.0
libtpu: 0.0.40
codegen_flags: <defaults>
</compile_context>

<pallas_src>
import math

import jax
import jax.numpy as jnp
from jax.experimental import pallas as pl
from jax.experimental.pallas import tpu as pltpu

_LANE = 128
_SUBLANE = 8
_TARGET_BLOCK_BYTES = 2 << 20  # ~2 MiB/block -> <= ~8 MiB VMEM with in+out double-buffered


def _copy_kernel(x_ref, o_ref):
    # Identity copy of one lane-dense tile.
    o_ref[...] = x_ref[...]


def _pick_lane_width(total):
    """Largest lane width (multiple of 128) dividing `total`, preferring one
    that leaves >= 8 rows so sublanes are fully utilized."""
    candidates = (2048, 1024, 512, 256, 128)
    for c in candidates:
        if total % c == 0 and total // c >= _SUBLANE:
            return c
    for c in candidates:
        if total % c == 0:
            return c
    return None


def _pick_row_tile(r, c, dsize):
    """Row-tile size: multiple of 8 (or the full row count), sized to roughly
    _TARGET_BLOCK_BYTES per block."""
    max_rows = max(_SUBLANE,
                   (_TARGET_BLOCK_BYTES // max(1, c * dsize)) // _SUBLANE * _SUBLANE)
    if r <= max_rows:
        return r  # one block covering the full row dim -> always a legal block shape
    # Prefer an exact divisor (multiple of 8) so there is no masked tail block.
    for cand in range(max_rows, _SUBLANE - 1, -_SUBLANE):
        if r % cand == 0:
            return cand
    return max_rows  # non-divisor: Pallas masks the final partial block


def layer_readout(x, *, use_kernel=True):
    """Pallas equivalent of LayerReadout.forward: x.view(B, -1).

    use_kernel=False -> free metadata-only reshape (recommended in practice).
    use_kernel=True  -> identity data movement via a tiled, lane-dense,
                        input/output-aliased Pallas copy kernel.
    """
    b = x.shape[0]
    f = math.prod(x.shape[1:]) if x.ndim > 1 else 1

    if not use_kernel:
        return x.reshape(b, f)

    total = b * f
    dsize = jnp.dtype(x.dtype).itemsize
    c = _pick_lane_width(total)

    if c is None:
        # Total elements not a multiple of 128: fall back to a single
        # full-array block (legal; edge stores are masked by the compiler).
        r, c = b, f
        tr = r
        slab = x.reshape(r, c)
    else:
        r = total // c
        slab = x.reshape(r, c)
        tr = _pick_row_tile(r, c, dsize)

    grid = (pl.cdiv(r, tr),)

    out = pl.pallas_call(
        _copy_kernel,
        out_shape=jax.ShapeDtypeStruct((r, c), x.dtype),
        grid_spec=pl.GridSpec(
            grid=grid,
            in_specs=[pl.BlockSpec((tr, c), lambda i: (i, 0))],
            out_specs=pl.BlockSpec((tr, c), lambda i: (i, 0)),
        ),
        # Output aliases the input slab: identity copy needs no second HBM buffer.
        input_output_aliases={0: 0},
        compiler_params=pltpu.CompilerParams(
            dimension_semantics=("parallel",),  # shards the row-tile loop across v7x's 2 TCs
        ),
    )(slab)

    return out.reshape(b, f)


if __name__ == "__main__":
    key = jax.random.PRNGKey(0)
    B, C, H, W = 2, 4, 16, 16
    x = jax.random.normal(key, (B, C, H, W), dtype=jnp.float32)

    # Reference semantics: x.view(B, -1) — computed before the (aliasing) kernel call.
    ref = x.reshape(B, C * H * W)

    out = layer_readout(x)  # exercises the Pallas kernel path
    out = jax.block_until_ready(out)

    assert out.shape == (B, C * H * W), out.shape
    assert out.dtype == x.dtype
    assert bool(jnp.array_equal(out, ref))

    print("KERNEL_OK")
</pallas_src>

<mosaic_0001>
module attributes {stable_mosaic.version = 11 : i64} {
  func.func @_copy_kernel(%arg0: i32, %arg1: memref<8x256xf32, #tpu.memory_space<vmem>>, %arg2: memref<8x256xf32, #tpu.memory_space<vmem>>) attributes {dimension_semantics = [#tpu.dimension_semantics<parallel>], iteration_bounds = array<i64: 1>, scalar_prefetch = 0 : i64, scratch_operands = 0 : i64, tpu.core_type = #tpu.core_type<tc>, window_params = [{transform_indices = @transform_0, window_bounds = array<i64: 8, 256>}, {transform_indices = @transform_1, window_bounds = array<i64: 8, 256>}]} {
    %c0 = arith.constant 0 : index
    %c0_0 = arith.constant 0 : index
    %0 = vector.load %arg1[%c0, %c0_0] : memref<8x256xf32, #tpu.memory_space<vmem>>, vector<8x256xf32>
    %c0_1 = arith.constant 0 : index
    %c0_2 = arith.constant 0 : index
    %1 = vector.load %arg2[%c0_1, %c0_2] : memref<8x256xf32, #tpu.memory_space<vmem>>, vector<8x256xf32>
    tpu.vector_store %arg2[%c0_1, %c0_2], %0 {strides = array<i32>} : memref<8x256xf32, #tpu.memory_space<vmem>>, vector<8x256xf32>,
    return
  }
  func.func @transform_0(%arg0: i32) -> (i32, i32) {
    %c0_i32 = arith.constant 0 : i32
    %c0_i32_0 = arith.constant 0 : i32
    return %arg0, %c0_i32 : i32, i32
  }
  func.func @transform_1(%arg0: i32) -> (i32, i32) {
    %c0_i32 = arith.constant 0 : i32
    %c0_i32_0 = arith.constant 0 : i32
    return %arg0, %c0_i32 : i32, i32
  }
}

</mosaic_0001>

<bundles_post_ra>
// kernel: tpu_custom_call.1
= control target key start
LH: loop header
LB: loop body
LE: loop exit
PB: predicated region body
PF: predicated region fallthrough
CT: control target
= control target key end

     0   :  { %6 = vsyncpa [#allocation3], 0  ;;  %s116_s0 = inlined_call_operand.hbm [shape: f32[8,256], index: 0, kind: input, shape index: {}, may-alias: {0,1}]   ;;  %s117_s1 = inlined_call_operand.hbm [shape: f32[8,256], index: 1, kind: output, shape index: {}, may-alias: {0,1}]  }
   0x1   :  { %7 = vsyncpa [#allocation4], 0  ;;  %s13_s8 = sshll.u32 %s116_s0, 4  ;;  %s98_s9 = smov [#allocation2]   ;;  %s14_s8 = int_to_ptr.hbm [resolvable:$true] %s13_s8 }
   0x2   :  { %s15_s10 = sshll.u32 %s98_s9, 4  ;;  %s16_s10 = int_to_ptr.vmem [resolvable:$true] %s15_s10 }
   0x3   :  { %18 = dma.hbm_to_vmem [thread:$0]  %s14_s8, 256, %s16_s10, [#allocation3]  }
   0x4   :  { %94 = dma.done.wait [#allocation3], 256  }
   0x5   :  { %95 = vsyncadd [#allocation3], 4294967040  ;;  %s99_s11 = smov [#allocation5]   ;;  %s34_s15 = sshll.u32 %s117_s1, 4  ;;  %v23_v0 = vld [vmem:[#allocation2] sm:$0xff]  ;;  %v24_v1 = vld [vmem:[#allocation2 + $0x8] sm:$0xff]  ;;  %s35_s15 = int_to_ptr.hbm [resolvable:$true] %s34_s15 }
   0x6   :  { %s32_s12 = sshll.u32 %s99_s11, 4  ;;  %25 = vst [vmem:[#allocation5] sm:$0xff] %v23_v0  ;;  %s33_s12 = int_to_ptr.vmem [resolvable:$true] %s32_s12 }
   0x7   :  { %26 = vst [vmem:[#allocation5 + $0x8] sm:$0xff] %v24_v1 }
   0x8   :  { %37 = dma.vmem_to_hbm [thread:$0]  %s33_s12, 256, %s35_s15, [#allocation4]  }
   0x9   :  { %96 = dma.done.wait [#allocation4], 256  }
   0xa   :  { %97 = vsyncadd [#allocation4], 4294967040 }
   0xb   :  { %42 = vsyncpa [#allocation3], 1 }
   0xc   :  { %43 = vsyncpa [#allocation4], 1 }

</bundles_post_ra>
